<compile_context>
chip_gen: v7x
topology: tpu7x:2x2x1
jax: 0.10.0
libtpu: 0.0.40
codegen_flags: <defaults>
</compile_context>

<pallas_src>
import functools

import jax
import jax.numpy as jnp
from jax.experimental import pallas as pl
from jax.experimental.pallas import tpu as pltpu


def _round_up(x, m):
    return (x + m - 1) // m * m


# --------------------------------------------------------------------------- #
# Kernel
# --------------------------------------------------------------------------- #
def _film_kernel(film_ref, tbf_ref, wgb_ref, wo_ref, bgb_ref, bo_ref, out_ref,
                 *, dim_pad):
    film = film_ref[...]                                        # bf16 (TB, Kin)
    # Fused gamma|beta projection: a single MXU matmul, f32 accumulation.
    gb = jnp.dot(film, wgb_ref[...],
                 preferred_element_type=jnp.float32) + bgb_ref[...]
    gamma = gb[:, :dim_pad]          # 128-aligned static slice -> free
    beta = gb[:, dim_pad:]
    # FiLM modulation in f32 on the VPU (lane-dense vregs).
    mod = gamma * tbf_ref[...].astype(jnp.float32) + beta
    # Output projection; cast to bf16 only immediately before the MXU.
    out = jnp.dot(mod.astype(jnp.bfloat16), wo_ref[...],
                  preferred_element_type=jnp.float32) + bo_ref[...]
    out_ref[...] = out.astype(out_ref.dtype)


# --------------------------------------------------------------------------- #
# Wrapper-side parameter prep (one-time)
# --------------------------------------------------------------------------- #
def _prepare_params(params):
    """Lane-pad `dim` and `output_dim` to multiples of 128, fuse the gamma/beta
    weights into a single (input_dim, 2*dim_pad) matrix, and cast to bf16."""
    w_fc, b_fc = params["w_fc"], params["b_fc"]
    w_out, b_out = params["w_out"], params["b_out"]
    input_dim, two_dim = w_fc.shape
    dim = two_dim // 2
    output_dim = w_out.shape[1]
    dim_pad = _round_up(dim, 128)
    n_pad = _round_up(output_dim, 128)

    def pad_cols(w, width):
        return jnp.pad(w, ((0, 0), (0, width - w.shape[1])))

    w_gamma = pad_cols(w_fc[:, :dim], dim_pad)
    w_beta = pad_cols(w_fc[:, dim:two_dim], dim_pad)
    w_gb = jnp.concatenate([w_gamma, w_beta], axis=1).astype(jnp.bfloat16)

    b_gamma = jnp.pad(b_fc[:dim], (0, dim_pad - dim))
    b_beta = jnp.pad(b_fc[dim:two_dim], (0, dim_pad - dim))
    b_gb = jnp.concatenate([b_gamma, b_beta]).reshape(1, 2 * dim_pad) \
              .astype(jnp.float32)

    w_out_p = jnp.pad(w_out, ((0, dim_pad - dim),
                              (0, n_pad - output_dim))).astype(jnp.bfloat16)
    b_out_p = jnp.pad(b_out, (0, n_pad - output_dim)).reshape(1, n_pad) \
                 .astype(jnp.float32)

    return dict(input_dim=input_dim, dim=dim, dim_pad=dim_pad,
                output_dim=output_dim, n_pad=n_pad,
                w_gb=w_gb, b_gb=b_gb, w_out=w_out_p, b_out=b_out_p)


# --------------------------------------------------------------------------- #
# VMEM budgeting (generation-aware)
# --------------------------------------------------------------------------- #
def _vmem_capacity_bytes():
    try:
        cap = getattr(pltpu.get_tpu_info(), "vmem_capacity_bytes", None)
        if cap:
            return int(cap)
    except Exception:
        pass
    return 64 << 20  # conservative fallback (v7x per-TC physical VMEM)


def _vmem_budget_bytes(tb, kin, dim_pad, n_pad, out_itemsize):
    act = 2 * tb * (kin + dim_pad) * 2               # double-buffered bf16 inputs
    outb = 2 * tb * n_pad * out_itemsize             # double-buffered output tile
    weights = kin * 2 * dim_pad * 2 + dim_pad * n_pad * 2   # bf16, resident
    biases = (2 * dim_pad + n_pad) * 4               # f32, resident
    # f32 intermediates: gb (2*dim_pad) + mod (dim_pad) + out acc (n_pad),
    # plus the bf16 cast of mod.
    temps = tb * (3 * dim_pad + n_pad) * 4 + tb * dim_pad * 2
    return act + outb + weights + biases + temps


# --------------------------------------------------------------------------- #
# Plain-XLA fast path (identical numerics to the kernel)
# --------------------------------------------------------------------------- #
def _film_xla(film, to_be_film, params):
    dim = params["w_fc"].shape[1] // 2
    f16 = film.astype(jnp.bfloat16)
    wg = params["w_fc"][:, :dim].astype(jnp.bfloat16)
    wb = params["w_fc"][:, dim:2 * dim].astype(jnp.bfloat16)
    gamma = jnp.dot(f16, wg, preferred_element_type=jnp.float32) \
        + params["b_fc"][:dim]
    beta = jnp.dot(f16, wb, preferred_element_type=jnp.float32) \
        + params["b_fc"][dim:2 * dim]
    mod = gamma * to_be_film.astype(jnp.bfloat16).astype(jnp.float32) + beta
    out = jnp.dot(mod.astype(jnp.bfloat16),
                  params["w_out"].astype(jnp.bfloat16),
                  preferred_element_type=jnp.float32) + params["b_out"]
    return out


# --------------------------------------------------------------------------- #
# Forward
# --------------------------------------------------------------------------- #
def film_forward(x, y, params, *, x_film=True, batch_tile=None, out_dtype=None,
                 use_pallas=None):
    """Pallas implementation of FiLM.forward. Returns (x, y, output)."""
    p = _prepare_params(params)
    kin, dim, dim_pad = p["input_dim"], p["dim"], p["dim_pad"]
    output_dim, n_pad = p["output_dim"], p["n_pad"]

    film = x if x_film else y
    to_be_film = y if x_film else x
    batch = film.shape[0]
    out_dtype = x.dtype if out_dtype is None else jnp.dtype(out_dtype)
    out_itemsize = jnp.dtype(out_dtype).itemsize

    if use_pallas is None:
        # Tiny problems: pallas_call fixed overhead dominates; fused XLA wins.
        use_pallas = batch * max(kin, dim_pad, n_pad) >= (1 << 18)
    if not use_pallas:
        return x, y, _film_xla(film, to_be_film, params).astype(out_dtype)

    # --- generation-aware tile / VMEM selection --------------------------- #
    vmem_cap = _vmem_capacity_bytes()
    cap = int(0.75 * vmem_cap)                 # ~48 MiB v7x, ~96 MiB v5e/v6e
    if batch_tile is None:
        batch_tile = 1024 if vmem_cap >= (96 << 20) else 512

    tb = _round_up(max(min(batch_tile, batch), 1), 16)      # 16-row (bf16) align
    if batch >= 32:
        # >=2 grid steps so both v7x TensorCores get work (free on v5e/v6e).
        tb = min(tb, _round_up(pl.cdiv(batch, 2), 16))
    headroom = 4 << 20
    while tb > 16 and (_vmem_budget_bytes(tb, kin, dim_pad, n_pad, out_itemsize)
                       + headroom > cap):
        tb = max(16, _round_up(tb // 2, 16))
    n_tiles = pl.cdiv(batch, tb)
    tb = _round_up(pl.cdiv(batch, n_tiles), 16)   # re-balance; never increases tb
    pb = n_tiles * tb
    grid = (n_tiles,)

    vmem_limit = int(min(
        max(_vmem_budget_bytes(tb, kin, dim_pad, n_pad, out_itemsize) + headroom,
            32 << 20),
        cap))

    # --- activations: cast to bf16 once, pad batch rows / tbf lanes -------- #
    film_p = jnp.pad(film.astype(jnp.bfloat16), ((0, pb - batch), (0, 0)))
    tbf_p = jnp.pad(to_be_film.astype(jnp.bfloat16),
                    ((0, pb - batch), (0, dim_pad - dim)))

    def resident(shape):
        # Constant block index -> stays VMEM-resident, DMA'd once.
        return pl.BlockSpec(shape, lambda i: (0, 0))

    out_padded = pl.pallas_call(
        functools.partial(_film_kernel, dim_pad=dim_pad),
        out_shape=jax.ShapeDtypeStruct((pb, n_pad), out_dtype),
        grid=grid,
        in_specs=[
            pl.BlockSpec((tb, kin), lambda i: (i, 0)),      # film
            pl.BlockSpec((tb, dim_pad), lambda i: (i, 0)),  # to_be_film (padded)
            resident((kin, 2 * dim_pad)),                   # W_gamma | W_beta
            resident((dim_pad, n_pad)),                     # W_out (lane-padded)
            resident((1, 2 * dim_pad)),                     # b_gamma | b_beta
            resident((1, n_pad)),                           # b_out
        ],
        out_specs=pl.BlockSpec((tb, n_pad), lambda i: (i, 0)),
        compiler_params=pltpu.CompilerParams(
            dimension_semantics=("parallel",),
            vmem_limit_bytes=vmem_limit),
    )(film_p, tbf_p, p["w_gb"], p["w_out"], p["b_gb"], p["b_out"])

    out = out_padded[:batch, :output_dim]
    return x, y, out


# --------------------------------------------------------------------------- #
# Synthetic init + references
# --------------------------------------------------------------------------- #
def init_params(key, input_dim, dim, output_dim, dtype=jnp.float32):
    k1, k2, k3, k4 = jax.random.split(key, 4)
    w_fc = jax.random.uniform(k1, (input_dim, 2 * dim), dtype,
                              -1.0, 1.0) / jnp.sqrt(input_dim).astype(dtype)
    b_fc = jax.random.uniform(k2, (2 * dim,), dtype,
                              -1.0, 1.0) / jnp.sqrt(input_dim).astype(dtype)
    w_out = jax.random.uniform(k3, (dim, output_dim), dtype,
                               -1.0, 1.0) / jnp.sqrt(dim).astype(dtype)
    b_out = jax.random.uniform(k4, (output_dim,), dtype,
                               -1.0, 1.0) / jnp.sqrt(dim).astype(dtype)
    return {"w_fc": w_fc, "b_fc": b_fc, "w_out": w_out, "b_out": b_out}


def film_reference_f32(x, y, params, *, x_film=True):
    """Pure-JAX f32 reference matching the PyTorch forward."""
    film = x if x_film else y
    to_be_film = y if x_film else x
    h = film @ params["w_fc"] + params["b_fc"]
    dim = params["w_fc"].shape[1] // 2
    gamma, beta = h[:, :dim], h[:, dim:2 * dim]
    out = gamma * to_be_film + beta
    out = out @ params["w_out"] + params["b_out"]
    return x, y, out


def film_reference_bf16(x, y, params, *, x_film=True):
    """Reference that mirrors the kernel's bf16-matmul / f32-accumulate math."""
    film = x if x_film else y
    to_be_film = y if x_film else x
    return x, y, _film_xla(film, to_be_film, params)


# --------------------------------------------------------------------------- #
# Demo / self-test
# --------------------------------------------------------------------------- #
if __name__ == "__main__":
    # Small shapes consistent with the module: batch=20, input_dim=dim=32,
    # output_dim=16 (module default is 512/512/100; small keeps the demo fast).
    batch, input_dim, dim, output_dim = 20, 32, 32, 16

    key = jax.random.PRNGKey(0)
    kx, ky, kp = jax.random.split(key, 3)
    x = jax.random.normal(kx, (batch, input_dim), jnp.float32)
    y = jax.random.normal(ky, (batch, dim), jnp.float32)
    params = init_params(kp, input_dim, dim, output_dim)

    # Pallas path (forced, single-tile grid).
    x_out, y_out, out = film_forward(x, y, params, x_film=True, use_pallas=True)
    jax.block_until_ready(out)
    # Pallas path with a multi-step grid (batch_tile=8 -> 2 tiles of 16 rows).
    _, _, out_tiled = film_forward(x, y, params, x_film=True, batch_tile=8,
                                   use_pallas=True)
    jax.block_until_ready(out_tiled)
    # y-film path.
    _, _, out_yfilm = film_forward(x, y, params, x_film=False, use_pallas=True)
    jax.block_until_ready(out_yfilm)
    # XLA fast path (tiny-shape default) for consistency.
    _, _, out_fast = film_forward(x, y, params, x_film=True, use_pallas=False)

    _, _, ref16 = film_reference_bf16(x, y, params, x_film=True)
    _, _, ref32 = film_reference_f32(x, y, params, x_film=True)
    _, _, ref16_y = film_reference_bf16(x, y, params, x_film=False)

    assert jnp.allclose(out, ref16, atol=2e-3, rtol=2e-3), "mismatch vs bf16 ref"
    assert jnp.allclose(out, ref32, atol=5e-2, rtol=5e-2), "mismatch vs f32 ref"
    assert jnp.allclose(out_tiled, ref16, atol=2e-3, rtol=2e-3), "tiled mismatch"
    assert jnp.allclose(out_yfilm, ref16_y, atol=2e-3, rtol=2e-3), "y-film mismatch"
    assert jnp.allclose(out_fast, ref16, atol=2e-3, rtol=2e-3), "fast-path mismatch"
    assert jnp.array_equal(x_out, x) and jnp.array_equal(y_out, y)

    print("KERNEL_OK")
</pallas_src>

<mosaic_0001>
module attributes {stable_mosaic.version = 11 : i64} {
  func.func @_film_kernel(%arg0: i32, %arg1: memref<32x32xbf16, #tpu.memory_space<vmem>>, %arg2: memref<32x128xbf16, #tpu.memory_space<vmem>>, %arg3: memref<32x256xbf16, #tpu.memory_space<vmem>>, %arg4: memref<128x128xbf16, #tpu.memory_space<vmem>>, %arg5: memref<1x256xf32, #tpu.memory_space<vmem>>, %arg6: memref<1x128xf32, #tpu.memory_space<vmem>>, %arg7: memref<32x128xf32, #tpu.memory_space<vmem>>) attributes {dimension_semantics = [#tpu.dimension_semantics<parallel>], iteration_bounds = array<i64: 1>, scalar_prefetch = 0 : i64, scratch_operands = 0 : i64, tpu.core_type = #tpu.core_type<tc>, window_params = [{transform_indices = @transform_0, window_bounds = array<i64: 32, 32>}, {transform_indices = @transform_1, window_bounds = array<i64: 32, 128>}, {pipeline_mode = #tpu.pipeline_mode<synchronous>, transform_indices = @transform_2, window_bounds = array<i64: 32, 256>}, {pipeline_mode = #tpu.pipeline_mode<synchronous>, transform_indices = @transform_3, window_bounds = array<i64: 128, 128>}, {pipeline_mode = #tpu.pipeline_mode<synchronous>, transform_indices = @transform_4, window_bounds = array<i64: 1, 256>}, {pipeline_mode = #tpu.pipeline_mode<synchronous>, transform_indices = @transform_5, window_bounds = array<i64: 1, 128>}, {transform_indices = @transform_6, window_bounds = array<i64: 32, 128>}]} {
    %c0 = arith.constant 0 : index
    %c0_0 = arith.constant 0 : index
    %0 = vector.load %arg1[%c0, %c0_0] : memref<32x32xbf16, #tpu.memory_space<vmem>>, vector<32x32xbf16>
    %c0_1 = arith.constant 0 : index
    %c0_2 = arith.constant 0 : index
    %1 = vector.load %arg3[%c0_1, %c0_2] : memref<32x256xbf16, #tpu.memory_space<vmem>>, vector<32x256xbf16>
    %cst = arith.constant dense<0.000000e+00> : vector<32x256xf32>
    %2 = tpu.matmul %0, %1, %cst {dimension_numbers = #tpu.dot_dimension_numbers<[1], [0], [0], [1], [0, 0, 1, 1], [], []>} : vector<32x32xbf16>, vector<32x256xbf16>, vector<32x256xf32> -> vector<32x256xf32>
    %c0_3 = arith.constant 0 : index
    %c0_4 = arith.constant 0 : index
    %3 = vector.load %arg5[%c0_3, %c0_4] : memref<1x256xf32, #tpu.memory_space<vmem>>, vector<1x256xf32>
    %4 = vector.broadcast %3 : vector<1x256xf32> to vector<32x256xf32>
    %5 = arith.addf %2, %4 : vector<32x256xf32>
    %6 = vector.extract_strided_slice %5 {offsets = [0, 0], sizes = [32, 128], strides = [1, 1]} : vector<32x256xf32> to vector<32x128xf32>
    %7 = vector.extract_strided_slice %5 {offsets = [0, 128], sizes = [32, 128], strides = [1, 1]} : vector<32x256xf32> to vector<32x128xf32>
    %c0_5 = arith.constant 0 : index
    %c0_6 = arith.constant 0 : index
    %8 = vector.load %arg2[%c0_5, %c0_6] : memref<32x128xbf16, #tpu.memory_space<vmem>>, vector<32x128xbf16>
    %9 = arith.extf %8 : vector<32x128xbf16> to vector<32x128xf32>
    %10 = arith.mulf %6, %9 : vector<32x128xf32>
    %11 = arith.addf %10, %7 : vector<32x128xf32>
    %12 = arith.truncf %11 : vector<32x128xf32> to vector<32x128xbf16>
    %c0_7 = arith.constant 0 : index
    %c0_8 = arith.constant 0 : index
    %13 = vector.load %arg4[%c0_7, %c0_8] : memref<128x128xbf16, #tpu.memory_space<vmem>>, vector<128x128xbf16>
    %cst_9 = arith.constant dense<0.000000e+00> : vector<32x128xf32>
    %14 = tpu.matmul %12, %13, %cst_9 {dimension_numbers = #tpu.dot_dimension_numbers<[1], [0], [0], [1], [0, 0, 1, 1], [], []>} : vector<32x128xbf16>, vector<128x128xbf16>, vector<32x128xf32> -> vector<32x128xf32>
    %c0_10 = arith.constant 0 : index
    %c0_11 = arith.constant 0 : index
    %15 = vector.load %arg6[%c0_10, %c0_11] : memref<1x128xf32, #tpu.memory_space<vmem>>, vector<1x128xf32>
    %16 = vector.broadcast %15 : vector<1x128xf32> to vector<32x128xf32>
    %17 = arith.addf %14, %16 : vector<32x128xf32>
    %c0_12 = arith.constant 0 : index
    %c0_13 = arith.constant 0 : index
    %18 = vector.load %arg7[%c0_12, %c0_13] : memref<32x128xf32, #tpu.memory_space<vmem>>, vector<32x128xf32>
    tpu.vector_store %arg7[%c0_12, %c0_13], %17 {strides = array<i32>} : memref<32x128xf32, #tpu.memory_space<vmem>>, vector<32x128xf32>,
    return
  }
  func.func @transform_0(%arg0: i32) -> (i32, i32) {
    %c0_i32 = arith.constant 0 : i32
    %c0_i32_0 = arith.constant 0 : i32
    return %arg0, %c0_i32 : i32, i32
  }
  func.func @transform_1(%arg0: i32) -> (i32, i32) {
    %c0_i32 = arith.constant 0 : i32
    %c0_i32_0 = arith.constant 0 : i32
    return %arg0, %c0_i32 : i32, i32
  }
  func.func @transform_2(%arg0: i32) -> (i32, i32) {
    %c0_i32 = arith.constant 0 : i32
    %c0_i32_0 = arith.constant 0 : i32
    %c0_i32_1 = arith.constant 0 : i32
    return %c0_i32, %c0_i32_0 : i32, i32
  }
  func.func @transform_3(%arg0: i32) -> (i32, i32) {
    %c0_i32 = arith.constant 0 : i32
    %c0_i32_0 = arith.constant 0 : i32
    %c0_i32_1 = arith.constant 0 : i32
    return %c0_i32, %c0_i32_0 : i32, i32
  }
  func.func @transform_4(%arg0: i32) -> (i32, i32) {
    %c0_i32 = arith.constant 0 : i32
    %c0_i32_0 = arith.constant 0 : i32
    %c0_i32_1 = arith.constant 0 : i32
    return %c0_i32, %c0_i32_0 : i32, i32
  }
  func.func @transform_5(%arg0: i32) -> (i32, i32) {
    %c0_i32 = arith.constant 0 : i32
    %c0_i32_0 = arith.constant 0 : i32
    %c0_i32_1 = arith.constant 0 : i32
    return %c0_i32, %c0_i32_0 : i32, i32
  }
  func.func @transform_6(%arg0: i32) -> (i32, i32) {
    %c0_i32 = arith.constant 0 : i32
    %c0_i32_0 = arith.constant 0 : i32
    return %arg0, %c0_i32 : i32, i32
  }
}

</mosaic_0001>

<bundles_post_ra>
// kernel: tpu_custom_call.1
= control target key start
LH: loop header
LB: loop body
LE: loop exit
PB: predicated region body
PF: predicated region fallthrough
CT: control target
= control target key end

     0   :  { %11 = vsyncpa [#allocation3], 0  ;;  %s684_s0 = inlined_call_operand.hbm [shape: bf16[32,32], index: 0, kind: input, shape index: {}]   ;;  %s685_s1 = inlined_call_operand.hbm [shape: bf16[32,128], index: 1, kind: input, shape index: {}]   ;;  %s686_s2 = inlined_call_operand.hbm [shape: bf16[32,256], index: 2, kind: input, shape index: {}]   ;;  %s687_s3 = inlined_call_operand.hbm [shape: bf16[128,128], index: 3, kind: input, shape index: {}]   ;;  %s688_s4 = inlined_call_operand.vmem [shape: f32[1,256], index: 4, kind: input, shape index: {}]   ;;  %s689_s5 = inlined_call_operand.vmem [shape: f32[1,128], index: 5, kind: input, shape index: {}]   ;;  %s690_s6 = inlined_call_operand.hbm [shape: f32[32,128], index: 6, kind: output, shape index: {}]  }
   0x1   :  { %12 = vsyncpa [#allocation6], 0 }
   0x2   :  { %13 = vsyncpa [#allocation9], 0 }
   0x3   :  { %14 = vsyncpa [#allocation4], 0  ;;  %s551_s21 = smov [#allocation5]   ;;  %s552_s23 = smov [#allocation2]  }
   0x4   :  { %s32_s22 = sshll.u32 %s551_s21, 4  ;;  %s20_s24 = sshll.u32 %s552_s23, 4  ;;  %s33_s22 = int_to_ptr.vmem [resolvable:$true] %s32_s22  ;;  %s596_s24 = int_to_ptr.vmem [resolvable:$true] %s20_s24 }
   0x5   :  { %s433_s27 = scalar_lea.hbm %s685_s1, 256 }
   0x6   :  { %p434_p0 = scmp.ne.s32.totalorder %s685_s1, %s433_s27  ;;  %p437_p1 = scmp.lt.u32.totalorder %s433_s27, %s685_s1 }
   0x8   :  { %p439_p2 = pnand %p437_p1, %p434_p0 }
   0xa   :  { %442 = shalt.err (!%p439_p2)
}
   0xb   :  { %s443_s8 = scalar_lea.vmem %s33_s22, 256  ;;  %p448_p4 = scmp.lt.s32.totalorder %s33_s22, %s33_s22 }
   0xc   :  { %p444_p3 = scmp.ne.s32.totalorder %s33_s22, %s443_s8  ;;  %p449_p5 = scmp.lt.s32.totalorder %s443_s8, %s443_s8 }
   0xe   :  { %p450_p6 = por %p449_p5, %p448_p4 }
  0x10   :  { %p451_p7 = pnand %p450_p6, %p444_p3 }
  0x12   :  { %454 = shalt.err (!%p451_p7)
}
  0x13   :  { %s553_s9 = smov 64   ;;  %s554_s10 = smov 4  }
  0x14   :  { %38 = dma.hbm_to_vmem [thread:$0]  %s685_s1, 256, %s33_s22, [#allocation6], %s553_s9, %s553_s9, %s554_s10  }
  0x15   :  { %s455_s15 = scalar_lea.hbm %s684_s0, 256 }
  0x16   :  { %p456_p8 = scmp.ne.s32.totalorder %s684_s0, %s455_s15  ;;  %p459_p9 = scmp.lt.u32.totalorder %s455_s15, %s684_s0 }
  0x18   :  { %p461_p10 = pnand %p459_p9, %p456_p8 }
  0x1a   :  { %464 = shalt.err (!%p461_p10)
}
  0x1b   :  { %s465_s20 = scalar_lea.vmem %s596_s24, 256  ;;  %p470_p12 = scmp.lt.s32.totalorder %s596_s24, %s596_s24 }
  0x1c   :  { %p466_p11 = scmp.ne.s32.totalorder %s596_s24, %s465_s20  ;;  %p471_p13 = scmp.lt.s32.totalorder %s465_s20, %s465_s20 }
  0x1e   :  { %p472_p0 = por %p471_p13, %p470_p12 }
  0x20   :  { %p473_p1 = pnand %p472_p0, %p466_p11 }
  0x22   :  { %476 = shalt.err (!%p473_p1)
}
  0x23   :  { %26 = dma.hbm_to_vmem [thread:$0]  %s684_s0, 256, %s596_s24, [#allocation3], %s553_s9, %s553_s9, %s554_s10  }
  0x24   :  { %s555_s22 = smov [#allocation7]   ;;  %s477_s27 = scalar_lea.hbm %s686_s2, 512 }
  0x25   :  { %s44_s23 = sshll.u32 %s555_s22, 4  ;;  %p478_p2 = scmp.ne.s32.totalorder %s686_s2, %s477_s27  ;;  %s45_s23 = int_to_ptr.vmem [resolvable:$true] %s44_s23 }
  0x26   :  { %p481_p3 = scmp.lt.u32.totalorder %s477_s27, %s686_s2 }
  0x28   :  { %p483_p4 = pnand %p481_p3, %p478_p2 }
  0x2a   :  { %486 = shalt.err (!%p483_p4)
}
  0x2b   :  { %s487_s8 = scalar_lea.vmem %s45_s23, 512  ;;  %p492_p6 = scmp.lt.s32.totalorder %s45_s23, %s45_s23 }
  0x2c   :  { %p488_p5 = scmp.ne.s32.totalorder %s45_s23, %s487_s8  ;;  %p493_p7 = scmp.lt.s32.totalorder %s487_s8, %s487_s8 }
  0x2e   :  { %p494_p8 = por %p493_p7, %p492_p6 }
  0x30   :  { %p495_p9 = pnand %p494_p8, %p488_p5 }
  0x32   :  { %498 = shalt.err (!%p495_p9)
}
  0x33   :  { %s556_s0 = smov 128   ;;  %s557_s24 = smov 8  }
  0x34   :  { %50 = dma.hbm_to_vmem [thread:$0]  %s686_s2, 512, %s45_s23, [#allocation6], %s556_s0, %s556_s0, %s557_s24  }
  0x35   :  { %s558_s13 = smov [#allocation8]   ;;  %s499_s17 = scalar_lea.hbm %s687_s3, 1024 }
  0x36   :  { %s56_s14 = sshll.u32 %s558_s13, 4  ;;  %p500_p10 = scmp.ne.s32.totalorder %s687_s3, %s499_s17  ;;  %s57_s14 = int_to_ptr.vmem [resolvable:$true] %s56_s14 }
  0x37   :  { %p503_p11 = scmp.lt.u32.totalorder %s499_s17, %s687_s3 }
  0x39   :  { %p505_p12 = pnand %p503_p11, %p500_p10 }
  0x3b   :  { %508 = shalt.err (!%p505_p12)
}
  0x3c   :  { %s509_s21 = scalar_lea.vmem %s57_s14, 1024  ;;  %p514_p0 = scmp.lt.s32.totalorder %s57_s14, %s57_s14 }
  0x3d   :  { %p510_p13 = scmp.ne.s32.totalorder %s57_s14, %s509_s21  ;;  %p515_p1 = scmp.lt.s32.totalorder %s509_s21, %s509_s21 }
  0x3f   :  { %p516_p2 = por %p515_p1, %p514_p0 }
  0x41   :  { %p517_p3 = pnand %p516_p2, %p510_p13 }
  0x43   :  { %520 = shalt.err (!%p517_p3)
}
  0x44   :  { %62 = dma.hbm_to_vmem [thread:$0]  %s687_s3, 1024, %s57_s14, [#allocation9], %s553_s9, %s553_s9, %s554_s10  }
  0x45   :  { %543 = dma.done.wait [#allocation3], 256  }
  0x46   :  { %544 = vsyncadd [#allocation3], 4294967040 }
  0x47   :  { %545 = dma.done.wait [#allocation6], 768  }
  0x48   :  { %546 = vsyncadd [#allocation6], 4294966528 }
  0x49   :  { %547 = dma.done.wait [#allocation9], 1024  }
  0x4a   :  { %548 = vsyncadd [#allocation9], 4294966272  ;;  %v559_v0 = vmov 0   ;;  %v417_v1 = vld [vmem:[#allocation7 + $0x4] ss:$8 sps:$4 sm:$0xff]   ;;  %vm130_vm0 = vcmask 261120   ;;  %v90_v15 = vlaneseq }
  0x4b   :  { %169 = vmatprep.mubr.bf16.mxu0 %v559_v0  ;;  %v419_v2 = vld [vmem:[#allocation7] ss:$8 sps:$4 sm:$0xff]   ;;  %137 = vmatprep.subr.bf16.mxu0 %v417_v1  ;;  %v420_v3 = vld [vmem:[#allocation7 + $0x14] ss:$8 sps:$4 sm:$0xff]   ;;  %v422_v4 = vld [vmem:[#allocation7 + $0x10] ss:$8 sps:$4 sm:$0xff]  }
  0x4c   :  { %138 = vmatpush1.bf16.msra.mxu0 %v419_v2  ;;  %v423_v5 = vld [vmem:[#allocation2] sm:$0xff]   ;;  %v426_v7 = vld [vmem:[#allocation8 + $0x8] sm:$0xff]   ;;  %v427_v8 = vld [vmem:[#allocation8 + $0x10] sm:$0xff]   ;;  %v91_v16 = vshrl.u32 %v90_v15, 7  ;;  %s560_s23 = smov [#allocation10]  }
  0x4d   :  { %139 = vmatprep.subr.bf16.mxu0 %v420_v3  ;;  %v425_v6 = vld [vmem:[#allocation8] sm:$0xff]   ;;  %v428_v9 = vld [vmem:[#allocation8 + $0x18] sm:$0xff]   ;;  %v424_v10 = vld [vmem:[#allocation2 + $0x8] sm:$0xff]   ;;  %s337_s25 = sshll.u32 %s560_s23, 4  ;;  %s338_s25 = int_to_ptr.vmem [resolvable:$true] %s337_s25 }
  0x4e   :  { %387 = vmatprep.subr.bf16.mxu1 %v425_v6  ;;  %v429_v11 = vld [vmem:[#allocation8 + $0x20] sm:$0xff]   ;;  %v430_v12 = vld [vmem:[#allocation8 + $0x28] sm:$0xff]   ;;  %v431_v13 = vld [vmem:[#allocation8 + $0x30] sm:$0xff]   ;;  %v92_v17 = vsub.s32 0, %v91_v16  ;;  %v96_v19 = vsub.s32 1, %v91_v16  ;;  %s521_s26 = scalar_lea.vmem %s338_s25, 512  ;;  %p526_p5 = scmp.lt.s32.totalorder %s338_s25, %s338_s25 }
  0x4f   :  { %388 = vmatpush3.bf16.msra.mxu1 %v425_v6  ;;  %v432_v14 = vld [vmem:[#allocation8 + $0x38] sm:$0xff]   ;;  %v88_v18 = vld [vmem:[%s688_s4] sm:$0x3]  ;;  %v369_v20 = vld [vmem:[#allocation5] sm:$0xff]   ;;  %p522_p4 = scmp.ne.s32.totalorder %s338_s25, %s521_s26  ;;  %p527_p6 = scmp.lt.s32.totalorder %s521_s26, %s521_s26 }
  0x50   :  { %140 = vmatpush1.bf16.msra.mxu0 %v422_v4  ;;  %389 = vmatprep.subr.bf16.mxu1 %v426_v7  ;;  %v93_v21 = vrot.slane %v88_v18, %v92_v17  ;;  %v97_v22 = vrot.slane %v88_v18, %v96_v19  ;;  %v370_v23 = vunpack.c.l.bf16 %v369_v20  ;;  %v371_v27 = vunpack.c.h.bf16 %v369_v20  ;;  %v376_v34 = vld [vmem:[#allocation5 + $0x8] sm:$0xff]   ;;  %v359_v54 = vld [vmem:[%s689_s5] ss:$0 sm:$0xff] }
  0x51   :  { %v374_v37 = vunpack.c.l.bf16 %v376_v34  ;;  %v375_v42 = vunpack.c.h.bf16 %v376_v34  ;;  %p528_p7 = por %p527_p6, %p526_p5 }
  0x53   :  { %357 = vmatmul.mubr.msk.bf16.vlgmr.msra.gmra.mrb[0].mxu0 %vm130_vm0, %v423_v5  ;;  %390 = vmatpush3.bf16.msra.mxu1 %v426_v7  ;;  %p529_p8 = pnand %p528_p7, %p522_p4 }
  0x54   :  { %179 = vmatprep.mubr.bf16.mxu0 %v559_v0  ;;  %391 = vmatprep.subr.bf16.mxu1 %v427_v8 }
  0x57   :  { %392 = vmatpush3.bf16.msra.mxu1 %v427_v8 }
  0x58   :  { %393 = vmatprep.subr.bf16.mxu1 %v428_v9 }
  0x5b   :  { %358 = vmatmul.mubr.msk.bf16.gmra.mrb[4].mxu0 %vm130_vm0, %v424_v10  ;;  %394 = vmatpush3.bf16.msra.mxu1 %v428_v9 }
  0x5c   :  { %395 = vmatprep.subr.bf16.mxu1 %v429_v11 }
  0x5f   :  { %396 = vmatpush3.bf16.msra.mxu1 %v429_v11 }
  0x60   :  { %397 = vmatprep.subr.bf16.mxu1 %v430_v12 }
  0x63   :  { %398 = vmatpush3.bf16.msra.mxu1 %v430_v12 }
  0x64   :  { %399 = vmatprep.subr.bf16.mxu1 %v431_v13 }
  0x67   :  { %400 = vmatpush3.bf16.msra.mxu1 %v431_v13 }
  0x68   :  { %401 = vmatprep.subr.bf16.mxu1 %v432_v14 }
  0x6b   :  { %402 = vmatpush3.bf16.msra.mxu1 %v432_v14 }
 0x126   :  { %v171_v24 = vpop.f32.mrb[0].mxu0 }
 0x127   :  { %v172_v25 = vadd.f32 %v171_v24, %v93_v21  ;;  %v173_v26 = vpop.f32.mrb[1].mxu0 }
 0x128   :  { %v174_v28 = vadd.f32 %v173_v26, %v97_v22  ;;  %v175_v29 = vpop.f32.mrb[2].mxu0 }
 0x129   :  { %v198_v30 = vmul.f32 %v370_v23, %v172_v25  ;;  %v176_v31 = vadd.f32 %v175_v29, %v93_v21  ;;  %v177_v32 = vpop.f32.mrb[3].mxu0 }
 0x12a   :  { %v178_v33 = vadd.f32 %v177_v32, %v97_v22 }
 0x12b   :  { %v199_v35 = vmul.f32 %v371_v27, %v176_v31  ;;  %v202_v36 = vadd.f32 %v198_v30, %v174_v28 }
 0x12d   :  { %v203_v38 = vadd.f32 %v199_v35, %v178_v33 }
 0x12e   :  { %v181_v39 = vpop.f32.mrb[4].mxu0 }
 0x12f   :  { %v182_v40 = vadd.f32 %v181_v39, %v93_v21  ;;  %v183_v41 = vpop.f32.mrb[5].mxu0  ;;  %v206_v43 = vpack.c.bf16 %v203_v38, %v202_v36 }
 0x130   :  { %v184_v44 = vadd.f32 %v183_v41, %v97_v22  ;;  %v185_v45 = vpop.f32.mrb[6].mxu0 }
 0x131   :  { %v200_v46 = vmul.f32 %v374_v37, %v182_v40  ;;  %v186_v47 = vadd.f32 %v185_v45, %v93_v21  ;;  %v187_v48 = vpop.f32.mrb[7].mxu0  ;;  %403 = vmatprep.mubr.bf16.mxu1 %v206_v43 }
 0x132   :  { %v188_v49 = vadd.f32 %v187_v48, %v97_v22 }
 0x133   :  { %v204_v50 = vadd.f32 %v200_v46, %v184_v44  ;;  %v201_v51 = vmul.f32 %v375_v42, %v186_v47 }
 0x135   :  { %v205_v52 = vadd.f32 %v201_v51, %v188_v49 }
 0x137   :  { %v207_v53 = vpack.c.bf16 %v205_v52, %v204_v50 }
 0x139   :  { %404 = vmatmul.mubr.bf16.vlgmr.msra.gmra.mrb[0].mxu1 %v207_v53 }
 0x20c   :  { %v405_v55 = vpop.f32.mrb[0].mxu1 }
 0x20d   :  { %v322_v56 = vadd.f32 %v405_v55, %v359_v54  ;;  %v313_v57 = vpop.f32.mrb[1].mxu1 }
 0x20e   :  { %v314_v58 = vadd.f32 %v359_v54, %v313_v57  ;;  %v406_v59 = vpop.f32.mrb[2].mxu1 }
 0x20f   :  { %330 = vst [vmem:[#allocation10 + $0x10] sm:$0xff] %v322_v56  ;;  %v325_v60 = vadd.f32 %v406_v59, %v359_v54  ;;  %v316_v61 = vpop.f32.mrb[3].mxu1 }
 0x210   :  { %328 = vst [vmem:[#allocation10] sm:$0xff] %v314_v58  ;;  %v317_v62 = vadd.f32 %v359_v54, %v316_v61 }
 0x211   :  { %331 = vst [vmem:[#allocation10 + $0x18] sm:$0xff] %v325_v60 }
 0x212   :  { %329 = vst [vmem:[#allocation10 + $0x8] sm:$0xff] %v317_v62 }
 0x213   :  { %532 = shalt.err (!%p529_p8)
}
 0x214   :  { %s533_s28 = scalar_lea.hbm %s690_s6, 512 }
 0x215   :  { %p534_p9 = scmp.ne.s32.totalorder %s690_s6, %s533_s28  ;;  %p537_p10 = scmp.lt.u32.totalorder %s533_s28, %s690_s6 }
 0x217   :  { %p539_p11 = pnand %p537_p10, %p534_p9 }
 0x219   :  { %542 = shalt.err (!%p539_p11)
}
 0x21a   :  { %343 = dma.vmem_to_hbm [thread:$0]  %s338_s25, 512, %s690_s6, [#allocation4], %s556_s0, %s556_s0, %s557_s24  }
 0x21b   :  { %549 = dma.done.wait [#allocation4], 512  }
 0x21c   :  { %550 = vsyncadd [#allocation4], 4294966784 }
 0x21d   :  { %347 = vsyncpa [#allocation3], 1 }
 0x21e   :  { %348 = vsyncpa [#allocation6], 1 }
 0x21f   :  { %349 = vsyncpa [#allocation9], 1 }
 0x220   :  { %350 = vsyncpa [#allocation4], 1 }

</bundles_post_ra>
